<compile_context>
chip_gen: v7x
topology: tpu7x:2x2x1
jax: 0.10.0
libtpu: 0.0.40
codegen_flags: <defaults>
</compile_context>

<pallas_src>
import functools

import jax
import jax.numpy as jnp
from jax.experimental import pallas as pl
from jax.experimental.pallas import tpu as pltpu

_VMEM_LIMIT = 48 * 1024 * 1024  # explicit; above v5e's 16 MiB scoped default,
                                # comfortably under v7x's 64 MiB physical.


def _round_up(x, m):
    return ((x + m - 1) // m) * m


def _pick_tile_multiple(total, base, cap):
    """Largest t = base*k with k | (total//base) and t <= cap."""
    n = total // base
    best = base
    for k in range(1, n + 1):
        if n % k == 0 and base * k <= cap:
            best = base * k
    return best


# ---------------------------------------------------------------------------
# Kernel 1: item-branch projection  T_item = P @ (V_i * r_i)   -> (B, Ki_p)
#   Contraction over n_items is grid-tiled ("arbitrary"); the small (B, Ki_p)
#   f32 output block stays resident and accumulates across steps.  Ki is
#   zero-padded to 128 so the resident output is lane-dense.
# ---------------------------------------------------------------------------
def _proj_item_kernel(p_ref, vr_ref, o_ref):
    @pl.when(pl.program_id(0) == 0)
    def _():
        o_ref[...] = jnp.zeros_like(o_ref)

    o_ref[...] += jnp.dot(p_ref[...], vr_ref[...],
                          preferred_element_type=jnp.float32)


def project_item(P, Vr_i, *, ti):
    B, Ni_p = P.shape
    Ki_p = Vr_i.shape[1]
    return pl.pallas_call(
        _proj_item_kernel,
        out_shape=jax.ShapeDtypeStruct((B, Ki_p), jnp.float32),
        grid_spec=pltpu.PrefetchScalarGridSpec(
            num_scalar_prefetch=0,
            grid=(Ni_p // ti,),
            in_specs=[
                pl.BlockSpec((B, ti), lambda k: (0, k)),      # P reduction tile (bf16)
                pl.BlockSpec((ti, Ki_p), lambda k: (k, 0)),   # (V_i * r_i) tile (bf16)
            ],
            out_specs=pl.BlockSpec((B, Ki_p), lambda k: (0, 0)),
        ),
        compiler_params=pltpu.CompilerParams(
            dimension_semantics=("arbitrary",),
            vmem_limit_bytes=_VMEM_LIMIT),
    )(P, Vr_i)


# ---------------------------------------------------------------------------
# Kernel 2: fused three-branch weighted combine.
#   grid = (item column tiles [parallel], n_users reduction tiles [arbitrary])
#   out[:, j] = w0 * P[:, j]
#             + (w1*T_item) @ V_i^T[:, j]                  (k == 0 only)
#             + sum_k F_user[:, k] @ adj[k, j]             (accumulated)
#   with F_user = w2 * (V_u[users]*r_u) @ V_u^T precomputed in the wrapper.
#   The (B, tn) f32 output block is the resident accumulator.
# ---------------------------------------------------------------------------
def _combine_kernel(w0_ref, p_ref, t_ref, viT_ref, fu_ref, adj_ref, o_ref):
    @pl.when(pl.program_id(1) == 0)
    def _():
        s_item = jnp.dot(t_ref[...], viT_ref[...],
                         preferred_element_type=jnp.float32)
        o_ref[...] = w0_ref[0] * p_ref[...].astype(jnp.float32) + s_item

    o_ref[...] += jnp.dot(fu_ref[...], adj_ref[...],
                          preferred_element_type=jnp.float32)


def combine_scores(w0, P, T_item, ViT, F_user, adj, *, tn, tu):
    B, Ni_p = P.shape
    Ki_p = T_item.shape[1]
    Nu_p = adj.shape[0]
    return pl.pallas_call(
        _combine_kernel,
        out_shape=jax.ShapeDtypeStruct((B, Ni_p), jnp.float32),
        grid_spec=pltpu.PrefetchScalarGridSpec(
            num_scalar_prefetch=0,
            grid=(Ni_p // tn, Nu_p // tu),
            in_specs=[
                pl.BlockSpec(memory_space=pltpu.MemorySpace.SMEM),   # (1,) w0
                pl.BlockSpec((B, tn), lambda j, k: (0, j)),          # P column tile
                pl.BlockSpec((B, Ki_p), lambda j, k: (0, 0)),        # w1*T_item (resident)
                pl.BlockSpec((Ki_p, tn), lambda j, k: (0, j)),       # V_i^T column tile
                pl.BlockSpec((B, tu), lambda j, k: (0, k)),          # w2*F_user tile
                pl.BlockSpec((tu, tn), lambda j, k: (k, j)),         # adj tile (dominant stream)
            ],
            out_specs=pl.BlockSpec((B, tn), lambda j, k: (0, j)),
        ),
        compiler_params=pltpu.CompilerParams(
            dimension_semantics=("parallel", "arbitrary"),
            vmem_limit_bytes=_VMEM_LIMIT),
    )(w0, P, T_item, ViT, F_user, adj)


# ---------------------------------------------------------------------------
# Model setup (mirrors UniversalSpectralCF.__init__ deterministically)
# ---------------------------------------------------------------------------
def poly_filter_response(eigenvals, coeffs):
    # TODO(synk): fl.SpectralBasisFilter internals are not provided; using a
    # deterministic polynomial spectral response sum_k c_k * lambda^k as stand-in.
    resp = jnp.zeros_like(eigenvals)
    for k in range(coeffs.shape[0]):
        resp = resp + coeffs[k] * eigenvals ** k
    return resp


def init_model(key, *, n_users, n_items, n_eigen, filter_order):
    (k_adj,) = jax.random.split(key, 1)
    adj = (jax.random.uniform(k_adj, (n_users, n_items)) < 0.15).astype(jnp.float32)

    row_sums = adj.sum(axis=1, keepdims=True) + 1e-8
    col_sums = adj.sum(axis=0, keepdims=True) + 1e-8
    norm_adj = adj / jnp.sqrt(row_sums) / jnp.sqrt(col_sums)

    with jax.default_matmul_precision("highest"):      # one-time setup, not hot path
        sim_user = norm_adj @ norm_adj.T
        sim_item = norm_adj.T @ norm_adj

    def topk_eig(sim, k):
        vals, vecs = jnp.linalg.eigh(sim)
        idx = jnp.argsort(-jnp.abs(vals))[:k]           # largest-magnitude (eigsh 'LM')
        return vals[idx].astype(jnp.float32), vecs[:, idx].astype(jnp.float32)

    k_u = min(n_eigen, n_users - 2)
    k_i = min(n_eigen, n_items - 2)
    user_eigenvals, user_eigenvecs = topk_eig(sim_user, k_u)
    item_eigenvals, item_eigenvecs = topk_eig(sim_item, k_i)

    base = jnp.array([1.0, -0.6, 0.2, -0.05, 0.01, -0.002, 0.0005, 0.0001],
                     dtype=jnp.float32)[: filter_order + 1]
    return {
        "adj": adj,
        "user_eigenvals": user_eigenvals, "user_eigenvecs": user_eigenvecs,
        "item_eigenvals": item_eigenvals, "item_eigenvecs": item_eigenvecs,
        "user_coeffs": base, "item_coeffs": base,
        "combination_weights": jnp.array([0.5, 0.3, 0.2], dtype=jnp.float32),  # 'ui'
    }


# ---------------------------------------------------------------------------
# One-time prep: padding, dtype conversion, filter responses, softmax.
# Runs ONCE; forward() never repeats this work.
# ---------------------------------------------------------------------------
def prepare_model(params, *, tn=512, tu=512, ti_cap=4096):
    adj = params["adj"].astype(jnp.float32)
    Nu, Ni = adj.shape
    Vu = params["user_eigenvecs"].astype(jnp.float32)
    Vi = params["item_eigenvecs"].astype(jnp.float32)
    Ku, Ki = Vu.shape[1], Vi.shape[1]

    resp_u = poly_filter_response(params["user_eigenvals"], params["user_coeffs"])
    resp_i = poly_filter_response(params["item_eigenvals"], params["item_coeffs"])

    # --- tile sizes & exact padding (tiles always divide the padded dims) ----
    tn = min(tn, _round_up(Ni, 128))
    Ni_p = _round_up(Ni, tn)
    tu = min(tu, _round_up(Nu, 128))
    Nu_p = _round_up(Nu, tu)
    ti = _pick_tile_multiple(Ni_p, tn, ti_cap)       # project_item reduction tile
    Ki_p = _round_up(Ki, 128)                        # lane-dense projection output

    # adjacency & eigen factors: bf16 (adj is 0/1 -> exact), zero-padded once
    adj_p = jnp.zeros((Nu_p, Ni_p), jnp.bfloat16).at[:Nu, :Ni].set(
        adj.astype(jnp.bfloat16))
    ViT_p = jnp.zeros((Ki_p, Ni_p), jnp.bfloat16).at[:Ki, :Ni].set(
        Vi.T.astype(jnp.bfloat16))
    Vr_i = jnp.zeros((Ni_p, Ki_p), jnp.bfloat16).at[:Ni, :Ki].set(
        (Vi * resp_i[None, :]).astype(jnp.bfloat16))

    # user-branch low-rank factors kept in f32 (tiny; combined in the wrapper)
    Gu_base = Vu * resp_u[None, :]                   # (Nu, Ku)
    VuT = Vu.T                                       # (Ku, Nu)

    weights = jax.nn.softmax(params["combination_weights"]).astype(jnp.float32)

    arrays = {
        "adj_p": adj_p, "ViT_p": ViT_p, "Vr_i": Vr_i,
        "Gu_base": Gu_base, "VuT": VuT, "weights": weights,
    }
    static = {"tn": tn, "tu": tu, "ti": ti, "Nu": Nu, "Ni": Ni}
    return arrays, static


# ---------------------------------------------------------------------------
# Forward pass (hot path)
# ---------------------------------------------------------------------------
@functools.partial(jax.jit, static_argnames=("tn", "tu", "ti", "Nu", "Ni"))
def forward(arrays, users, *, tn, tu, ti, Nu, Ni):
    adj_p = arrays["adj_p"]
    Nu_p, Ni_p = adj_p.shape
    B = users.shape[0]
    w = arrays["weights"]

    # glue: gathers + tiny user-factor dot + branch pre-scaling
    P = adj_p[users]                                           # (B, Ni_p) bf16, exact
    Gu = arrays["Gu_base"][users]                              # (B, Ku) f32
    F_user = w[2] * (Gu @ arrays["VuT"])                       # (B, Nu) f32, tiny dot
    F_user_p = jnp.zeros((B, Nu_p), jnp.bfloat16).at[:, :Nu].set(
        F_user.astype(jnp.bfloat16))

    # Pallas hot path
    T_item = project_item(P, arrays["Vr_i"], ti=ti)            # (B, Ki_p) f32
    T_item_s = (w[1] * T_item).astype(jnp.bfloat16)            # pre-scaled, tiny
    w0 = w[:1]                                                 # (1,) -> SMEM

    out = combine_scores(w0, P, T_item_s, arrays["ViT_p"], F_user_p, adj_p,
                         tn=tn, tu=tu)                         # (B, Ni_p) f32
    return out[:, :Ni]


# ---------------------------------------------------------------------------
# Pure-JAX reference (spec semantics, highest precision = ground truth)
# ---------------------------------------------------------------------------
def forward_ref(params, users):
    with jax.default_matmul_precision("highest"):
        adj = params["adj"]
        P = adj[users]
        resp_u = poly_filter_response(params["user_eigenvals"], params["user_coeffs"])
        resp_i = poly_filter_response(params["item_eigenvals"], params["item_coeffs"])
        Vu, Vi = params["user_eigenvecs"], params["item_eigenvecs"]
        M_user = Vu @ jnp.diag(resp_u) @ Vu.T
        M_item = Vi @ jnp.diag(resp_i) @ Vi.T
        scores = [P, P @ M_item, M_user[users] @ adj]
        w = jax.nn.softmax(params["combination_weights"])
        return w[0] * scores[0] + w[1] * scores[1] + w[2] * scores[2]


if __name__ == "__main__":
    n_users, n_items = 64, 256
    n_eigen, filter_order = 16, 6
    batch = 16

    key = jax.random.PRNGKey(0)
    k_init, k_users = jax.random.split(key)
    params = init_model(k_init, n_users=n_users, n_items=n_items,
                        n_eigen=n_eigen, filter_order=filter_order)
    users = jax.random.randint(k_users, (batch,), 0, n_users)

    arrays, static = prepare_model(params)          # one-time prep (hoisted)
    out = jax.block_until_ready(forward(arrays, users, **static))
    ref = jax.block_until_ready(forward_ref(params, users))

    assert out.shape == (batch, n_items) and out.dtype == jnp.float32
    max_err = float(jnp.max(jnp.abs(out - ref)))
    scale = max(1.0, float(jnp.max(jnp.abs(ref))))
    # bf16 MXU operands (f32 accumulate) vs. HIGHEST-precision reference
    assert max_err < 2e-2 * scale, f"mismatch vs reference, max abs err = {max_err}"
    print("KERNEL_OK")
</pallas_src>

<mosaic_0001>
module attributes {stable_mosaic.version = 11 : i64} {
  func.func @_proj_item_kernel(%arg0: i32, %arg1: memref<16x256xbf16, #tpu.memory_space<vmem>>, %arg2: memref<256x128xbf16, #tpu.memory_space<vmem>>, %arg3: memref<16x128xf32, #tpu.memory_space<vmem>>) attributes {dimension_semantics = [#tpu.dimension_semantics<arbitrary>], iteration_bounds = array<i64: 1>, scalar_prefetch = 0 : i64, scratch_operands = 0 : i64, tpu.core_type = #tpu.core_type<tc>, window_params = [{transform_indices = @transform_0, window_bounds = array<i64: 16, 256>}, {transform_indices = @transform_1, window_bounds = array<i64: 256, 128>}, {pipeline_mode = #tpu.pipeline_mode<synchronous>, transform_indices = @transform_2, window_bounds = array<i64: 16, 128>}]} {
    %c0_i32 = arith.constant 0 : i32
    %0 = arith.cmpi eq, %arg0, %c0_i32 : i32
    %1 = arith.extui %0 : i1 to i32
    %c0_i32_0 = arith.constant 0 : i32
    %2 = arith.cmpi ne, %1, %c0_i32_0 : i32
    scf.if %2 {
      %cst_8 = arith.constant 0.000000e+00 : f32
      %9 = vector.broadcast %cst_8 : f32 to vector<16x128xf32>
      %c0_9 = arith.constant 0 : index
      %c0_10 = arith.constant 0 : index
      %10 = vector.load %arg3[%c0_9, %c0_10] : memref<16x128xf32, #tpu.memory_space<vmem>>, vector<16x128xf32>
      tpu.vector_store %arg3[%c0_9, %c0_10], %9 {strides = array<i32>} : memref<16x128xf32, #tpu.memory_space<vmem>>, vector<16x128xf32>,
    } else {
    }
    %c0 = arith.constant 0 : index
    %c0_1 = arith.constant 0 : index
    %3 = vector.load %arg3[%c0, %c0_1] : memref<16x128xf32, #tpu.memory_space<vmem>>, vector<16x128xf32>
    %c0_2 = arith.constant 0 : index
    %c0_3 = arith.constant 0 : index
    %4 = vector.load %arg1[%c0_2, %c0_3] : memref<16x256xbf16, #tpu.memory_space<vmem>>, vector<16x256xbf16>
    %c0_4 = arith.constant 0 : index
    %c0_5 = arith.constant 0 : index
    %5 = vector.load %arg2[%c0_4, %c0_5] : memref<256x128xbf16, #tpu.memory_space<vmem>>, vector<256x128xbf16>
    %cst = arith.constant dense<0.000000e+00> : vector<16x128xf32>
    %6 = tpu.matmul %4, %5, %cst {dimension_numbers = #tpu.dot_dimension_numbers<[1], [0], [0], [1], [0, 0, 1, 1], [], []>} : vector<16x256xbf16>, vector<256x128xbf16>, vector<16x128xf32> -> vector<16x128xf32>
    %7 = arith.addf %3, %6 : vector<16x128xf32>
    %c0_6 = arith.constant 0 : index
    %c0_7 = arith.constant 0 : index
    %8 = vector.load %arg3[%c0_6, %c0_7] : memref<16x128xf32, #tpu.memory_space<vmem>>, vector<16x128xf32>
    tpu.vector_store %arg3[%c0_6, %c0_7], %7 {strides = array<i32>} : memref<16x128xf32, #tpu.memory_space<vmem>>, vector<16x128xf32>,
    return
  }
  func.func @transform_0(%arg0: i32) -> (i32, i32) {
    %c0_i32 = arith.constant 0 : i32
    %c0_i32_0 = arith.constant 0 : i32
    return %c0_i32, %arg0 : i32, i32
  }
  func.func @transform_1(%arg0: i32) -> (i32, i32) {
    %c0_i32 = arith.constant 0 : i32
    %c0_i32_0 = arith.constant 0 : i32
    return %arg0, %c0_i32 : i32, i32
  }
  func.func @transform_2(%arg0: i32) -> (i32, i32) {
    %c0_i32 = arith.constant 0 : i32
    %c0_i32_0 = arith.constant 0 : i32
    %c0_i32_1 = arith.constant 0 : i32
    return %c0_i32, %c0_i32_0 : i32, i32
  }
}

module attributes {stable_mosaic.version = 11 : i64} {
  func.func @_combine_kernel(%arg0: i32, %arg1: i32, %arg2: memref<1xf32, #tpu.memory_space<smem>>, %arg3: memref<16x256xbf16, #tpu.memory_space<vmem>>, %arg4: memref<16x128xbf16, #tpu.memory_space<vmem>>, %arg5: memref<128x256xbf16, #tpu.memory_space<vmem>>, %arg6: memref<16x128xbf16, #tpu.memory_space<vmem>>, %arg7: memref<128x256xbf16, #tpu.memory_space<vmem>>, %arg8: memref<16x256xf32, #tpu.memory_space<vmem>>) attributes {dimension_semantics = [#tpu.dimension_semantics<parallel>, #tpu.dimension_semantics<arbitrary>], iteration_bounds = array<i64: 1, 1>, scalar_prefetch = 0 : i64, scratch_operands = 0 : i64, tpu.core_type = #tpu.core_type<tc>, window_params = [{transform_indices = @transform_0, window_bounds = array<i64: 1>}, {transform_indices = @transform_1, window_bounds = array<i64: 16, 256>}, {pipeline_mode = #tpu.pipeline_mode<synchronous>, transform_indices = @transform_2, window_bounds = array<i64: 16, 128>}, {transform_indices = @transform_3, window_bounds = array<i64: 128, 256>}, {transform_indices = @transform_4, window_bounds = array<i64: 16, 128>}, {transform_indices = @transform_5, window_bounds = array<i64: 128, 256>}, {transform_indices = @transform_6, window_bounds = array<i64: 16, 256>}]} {
    %c0_i32 = arith.constant 0 : i32
    %0 = arith.cmpi eq, %arg1, %c0_i32 : i32
    %1 = arith.extui %0 : i1 to i32
    %c0_i32_0 = arith.constant 0 : i32
    %2 = arith.cmpi ne, %1, %c0_i32_0 : i32
    scf.if %2 {
      %c0_8 = arith.constant 0 : index
      %c0_9 = arith.constant 0 : index
      %9 = vector.load %arg4[%c0_8, %c0_9] : memref<16x128xbf16, #tpu.memory_space<vmem>>, vector<16x128xbf16>
      %c0_10 = arith.constant 0 : index
      %c0_11 = arith.constant 0 : index
      %10 = vector.load %arg5[%c0_10, %c0_11] : memref<128x256xbf16, #tpu.memory_space<vmem>>, vector<128x256xbf16>
      %cst_12 = arith.constant dense<0.000000e+00> : vector<16x256xf32>
      %11 = tpu.matmul %9, %10, %cst_12 {dimension_numbers = #tpu.dot_dimension_numbers<[1], [0], [0], [1], [0, 0, 1, 1], [], []>} : vector<16x128xbf16>, vector<128x256xbf16>, vector<16x256xf32> -> vector<16x256xf32>
      %c0_13 = arith.constant 0 : index
      %12 = memref.load %arg2[%c0_13] : memref<1xf32, #tpu.memory_space<smem>>
      %c0_14 = arith.constant 0 : index
      %c0_15 = arith.constant 0 : index
      %13 = vector.load %arg3[%c0_14, %c0_15] : memref<16x256xbf16, #tpu.memory_space<vmem>>, vector<16x256xbf16>
      %14 = arith.extf %13 : vector<16x256xbf16> to vector<16x256xf32>
      %15 = vector.broadcast %12 : f32 to vector<16x256xf32>
      %16 = arith.mulf %15, %14 : vector<16x256xf32>
      %17 = arith.addf %16, %11 : vector<16x256xf32>
      %c0_16 = arith.constant 0 : index
      %c0_17 = arith.constant 0 : index
      %18 = vector.load %arg8[%c0_16, %c0_17] : memref<16x256xf32, #tpu.memory_space<vmem>>, vector<16x256xf32>
      tpu.vector_store %arg8[%c0_16, %c0_17], %17 {strides = array<i32>} : memref<16x256xf32, #tpu.memory_space<vmem>>, vector<16x256xf32>,
    } else {
    }
    %c0 = arith.constant 0 : index
    %c0_1 = arith.constant 0 : index
    %3 = vector.load %arg8[%c0, %c0_1] : memref<16x256xf32, #tpu.memory_space<vmem>>, vector<16x256xf32>
    %c0_2 = arith.constant 0 : index
    %c0_3 = arith.constant 0 : index
    %4 = vector.load %arg6[%c0_2, %c0_3] : memref<16x128xbf16, #tpu.memory_space<vmem>>, vector<16x128xbf16>
    %c0_4 = arith.constant 0 : index
    %c0_5 = arith.constant 0 : index
    %5 = vector.load %arg7[%c0_4, %c0_5] : memref<128x256xbf16, #tpu.memory_space<vmem>>, vector<128x256xbf16>
    %cst = arith.constant dense<0.000000e+00> : vector<16x256xf32>
    %6 = tpu.matmul %4, %5, %cst {dimension_numbers = #tpu.dot_dimension_numbers<[1], [0], [0], [1], [0, 0, 1, 1], [], []>} : vector<16x128xbf16>, vector<128x256xbf16>, vector<16x256xf32> -> vector<16x256xf32>
    %7 = arith.addf %3, %6 : vector<16x256xf32>
    %c0_6 = arith.constant 0 : index
    %c0_7 = arith.constant 0 : index
    %8 = vector.load %arg8[%c0_6, %c0_7] : memref<16x256xf32, #tpu.memory_space<vmem>>, vector<16x256xf32>
    tpu.vector_store %arg8[%c0_6, %c0_7], %7 {strides = array<i32>} : memref<16x256xf32, #tpu.memory_space<vmem>>, vector<16x256xf32>,
    return
  }
  func.func @transform_0(%arg0: i32, %arg1: i32) -> i32 {
    %c0_i32 = arith.constant 0 : i32
    %c0_i32_0 = arith.constant 0 : i32
    return %c0_i32 : i32
  }
  func.func @transform_1(%arg0: i32, %arg1: i32) -> (i32, i32) {
    %c0_i32 = arith.constant 0 : i32
    %c0_i32_0 = arith.constant 0 : i32
    return %c0_i32, %arg0 : i32, i32
  }
  func.func @transform_2(%arg0: i32, %arg1: i32) -> (i32, i32) {
    %c0_i32 = arith.constant 0 : i32
    %c0_i32_0 = arith.constant 0 : i32
    %c0_i32_1 = arith.constant 0 : i32
    return %c0_i32, %c0_i32_0 : i32, i32
  }
  func.func @transform_3(%arg0: i32, %arg1: i32) -> (i32, i32) {
    %c0_i32 = arith.constant 0 : i32
    %c0_i32_0 = arith.constant 0 : i32
    return %c0_i32, %arg0 : i32, i32
  }
  func.func @transform_4(%arg0: i32, %arg1: i32) -> (i32, i32) {
    %c0_i32 = arith.constant 0 : i32
    %c0_i32_0 = arith.constant 0 : i32
    return %c0_i32, %arg1 : i32, i32
  }
  func.func @transform_5(%arg0: i32, %arg1: i32) -> (i32, i32) {
    %c0_i32 = arith.constant 0 : i32
    return %arg1, %arg0 : i32, i32
  }
  func.func @transform_6(%arg0: i32, %arg1: i32) -> (i32, i32) {
    %c0_i32 = arith.constant 0 : i32
    %c0_i32_0 = arith.constant 0 : i32
    return %c0_i32, %arg0 : i32, i32
  }
}

</mosaic_0001>

<bundles_post_ra>
// kernel: forward.2
= control target key start
LH: loop header
LB: loop body
LE: loop exit
PB: predicated region body
PF: predicated region fallthrough
CT: control target
= control target key end

     0   :  { %s344_s1 = inlined_call_operand.vmem [shape: bf16[256,128], index: 1, kind: input, shape index: {}]   ;;  %s345_s0 = inlined_call_operand.vmem [shape: bf16[16,256], index: 0, kind: input, shape index: {}]   ;;  %s346_s2 = inlined_call_operand.vmem [shape: f32[16,128], index: 2, kind: output, shape index: {}]  }
   0x1   :  { %v250_v0 = vld [vmem:[%s344_s1 + $0x40] sm:$0xff]   ;;  %v252_v2 = vld [vmem:[%s344_s1 + $0x48] sm:$0xff]   ;;  %v254_v4 = vld [vmem:[%s344_s1 + $0x50] sm:$0xff]  }
   0x2   :  { %v251_v1 = vld [vmem:[%s344_s1] sm:$0xff]   ;;  %227 = vmatprep.subr.bf16.mxu0 %v250_v0  ;;  %v253_v3 = vld [vmem:[%s344_s1 + $0x8] sm:$0xff]   ;;  %v255_v5 = vld [vmem:[%s344_s1 + $0x10] sm:$0xff]  }
   0x3   :  { %228 = vmatpush3.bf16.msra.mxu0 %v251_v1  ;;  %v256_v6 = vld [vmem:[%s344_s1 + $0x58] sm:$0xff]   ;;  %v258_v8 = vld [vmem:[%s344_s1 + $0x60] sm:$0xff]   ;;  %v260_v10 = vld [vmem:[%s344_s1 + $0x68] sm:$0xff]  }
   0x4   :  { %229 = vmatprep.subr.bf16.mxu0 %v252_v2  ;;  %v257_v7 = vld [vmem:[%s344_s1 + $0x18] sm:$0xff]   ;;  %v259_v9 = vld [vmem:[%s344_s1 + $0x20] sm:$0xff]   ;;  %v261_v12 = vld [vmem:[%s344_s1 + $0x28] sm:$0xff]  }
   0x5   :  { %v268_v11 = vld [vmem:[%s345_s0 + $0x4] ss:$8 sps:$4 sm:$0xff]   ;;  %v262_v13 = vld [vmem:[%s344_s1 + $0x70] sm:$0xff]   ;;  %v264_v15 = vld [vmem:[%s344_s1 + $0x78] sm:$0xff]  }
   0x6   :  { %192 = vmatprep.mubr.bf16.mxu0 %v268_v11  ;;  %v263_v14 = vld [vmem:[%s344_s1 + $0x30] sm:$0xff]   ;;  %v265_v16 = vld [vmem:[%s344_s1 + $0x38] sm:$0xff]   ;;  %v266_v17 = vld [vmem:[%s345_s0] ss:$8 sps:$4 sm:$0xff]  }
   0x7   :  { %230 = vmatpush3.bf16.msra.mxu0 %v253_v3 }
   0x8   :  { %231 = vmatprep.subr.bf16.mxu0 %v254_v4 }
   0xb   :  { %232 = vmatpush3.bf16.msra.mxu0 %v255_v5 }
   0xc   :  { %233 = vmatprep.subr.bf16.mxu0 %v256_v6 }
   0xf   :  { %234 = vmatpush3.bf16.msra.mxu0 %v257_v7 }
  0x10   :  { %235 = vmatprep.subr.bf16.mxu0 %v258_v8 }
  0x13   :  { %236 = vmatpush3.bf16.msra.mxu0 %v259_v9 }
  0x14   :  { %237 = vmatprep.subr.bf16.mxu0 %v260_v10 }
  0x17   :  { %238 = vmatpush3.bf16.msra.mxu0 %v261_v12 }
  0x18   :  { %239 = vmatprep.subr.bf16.mxu0 %v262_v13 }
  0x1b   :  { %240 = vmatpush3.bf16.msra.mxu0 %v263_v14 }
  0x1c   :  { %241 = vmatprep.subr.bf16.mxu0 %v264_v15 }
  0x1f   :  { %242 = vmatpush3.bf16.msra.mxu0 %v265_v16 }
  0x22   :  { %193 = vmatmul.mubr.bf16.vlgmr.msra.gmra.mrb[0].mxu0 %v266_v17 }
  0xf5   :  { %v243_v18 = vpop.f32.mrb[0].mxu0 }
  0xf6   :  { %v244_v19 = vpop.f32.mrb[1].mxu0 }
  0xf7   :  { %v245_v20 = vadd.f32 %v244_v19, %v243_v18  ;;  %v246_v21 = vpop.f32.mrb[2].mxu0 }
  0xf8   :  { %v247_v22 = vpop.f32.mrb[3].mxu0 }
  0xf9   :  { %v248_v23 = vadd.f32 %v247_v22, %v246_v21  ;;  %203 = vst [vmem:[%s346_s2] sm:$0xff] %v245_v20 }
  0xfb   :  { %204 = vst [vmem:[%s346_s2 + $0x8] sm:$0xff] %v248_v23 }

// kernel: forward.3
= control target key start
LH: loop header
LB: loop body
LE: loop exit
PB: predicated region body
PF: predicated region fallthrough
CT: control target
= control target key end

     0   :  { %v500_v2 = vmov 0   ;;  %s662_s0 = inlined_call_operand.<no memory space> [shape: f32[1], index: 0, kind: input, shape index: {}]   ;;  %s663_s1 = inlined_call_operand.vmem [shape: bf16[16,256], index: 1, kind: input, shape index: {}]   ;;  %s664_s2 = inlined_call_operand.vmem [shape: bf16[16,128], index: 2, kind: input, shape index: {}]   ;;  %s665_s3 = inlined_call_operand.vmem [shape: bf16[128,256], index: 3, kind: input, shape index: {}]   ;;  %s666_s4 = inlined_call_operand.vmem [shape: bf16[16,128], index: 4, kind: input, shape index: {}]   ;;  %s667_s5 = inlined_call_operand.vmem [shape: bf16[128,256], index: 5, kind: input, shape index: {}]   ;;  %s668_s6 = inlined_call_operand.hbm [shape: f32[16,256], index: 6, kind: output, shape index: {}]  }
   0x1   :  { %v426_v0 = vld [vmem:[%s665_s3 + $0x4] ss:$8 sps:$4 sm:$0xff]   ;;  %v428_v1 = vld [vmem:[%s665_s3] ss:$8 sps:$4 sm:$0xff]   ;;  %166 = vmatprep.mubr.bf16.mxu1 %v500_v2  ;;  %337 = vmatprep.mubr.bf16.mxu0 %v500_v2  ;;  %v429_v3 = vld [vmem:[%s665_s3 + $0x14] ss:$8 sps:$4 sm:$0xff]  }
   0x2   :  { %134 = vmatprep.subr.bf16.mxu1 %v426_v0  ;;  %v431_v4 = vld [vmem:[%s665_s3 + $0x10] ss:$8 sps:$4 sm:$0xff]   ;;  %v432_v5 = vld [vmem:[%s667_s5 + $0x4] ss:$8 sps:$4 sm:$0xff]   ;;  %v436_v7 = vld [vmem:[%s667_s5] ss:$8 sps:$4 sm:$0xff]  }
   0x3   :  { %135 = vmatpush1.bf16.msra.mxu1 %v428_v1  ;;  %v434_v6 = vld [vmem:[%s665_s3 + $0x24] ss:$8 sps:$4 sm:$0xff]   ;;  %305 = vmatprep.subr.bf16.mxu0 %v432_v5  ;;  %v438_v8 = vld [vmem:[%s667_s5 + $0x14] ss:$8 sps:$4 sm:$0xff]   ;;  %v437_v9 = vld [vmem:[%s665_s3 + $0x20] ss:$8 sps:$4 sm:$0xff]  }
   0x4   :  { %136 = vmatprep.subr.bf16.mxu1 %v429_v3  ;;  %306 = vmatpush1.bf16.msra.mxu0 %v436_v7  ;;  %v440_v10 = vld [vmem:[%s665_s3 + $0x34] ss:$8 sps:$4 sm:$0xff]   ;;  %v442_v11 = vld [vmem:[%s667_s5 + $0x10] ss:$8 sps:$4 sm:$0xff]   ;;  %v444_v12 = vld [vmem:[%s667_s5 + $0x24] ss:$8 sps:$4 sm:$0xff]  }
   0x5   :  { %307 = vmatprep.subr.bf16.mxu0 %v438_v8  ;;  %v443_v13 = vld [vmem:[%s665_s3 + $0x30] ss:$8 sps:$4 sm:$0xff]   ;;  %v448_v14 = vld [vmem:[%s667_s5 + $0x20] ss:$8 sps:$4 sm:$0xff]   ;;  %v450_v15 = vld [vmem:[%s667_s5 + $0x34] ss:$8 sps:$4 sm:$0xff]  }
   0x6   :  { %v446_v16 = vld [vmem:[%s665_s3 + $0x44] ss:$8 sps:$4 sm:$0xff]   ;;  %v454_v17 = vld [vmem:[%s667_s5 + $0x30] ss:$8 sps:$4 sm:$0xff]   ;;  %v449_v18 = vld [vmem:[%s665_s3 + $0x40] ss:$8 sps:$4 sm:$0xff]  }
   0x7   :  { %137 = vmatpush1.bf16.msra.mxu1 %v431_v4  ;;  %v456_v19 = vld [vmem:[%s667_s5 + $0x44] ss:$8 sps:$4 sm:$0xff]   ;;  %v452_v20 = vld [vmem:[%s665_s3 + $0x54] ss:$8 sps:$4 sm:$0xff]   ;;  %v455_v21 = vld [vmem:[%s665_s3 + $0x50] ss:$8 sps:$4 sm:$0xff]  }
   0x8   :  { %138 = vmatprep.subr.bf16.mxu1 %v434_v6  ;;  %308 = vmatpush1.bf16.msra.mxu0 %v442_v11  ;;  %v460_v22 = vld [vmem:[%s667_s5 + $0x40] ss:$8 sps:$4 sm:$0xff]   ;;  %v462_v23 = vld [vmem:[%s667_s5 + $0x54] ss:$8 sps:$4 sm:$0xff]   ;;  %v458_v24 = vld [vmem:[%s665_s3 + $0x64] ss:$8 sps:$4 sm:$0xff]  }
   0x9   :  { %309 = vmatprep.subr.bf16.mxu0 %v444_v12  ;;  %v466_v25 = vld [vmem:[%s667_s5 + $0x50] ss:$8 sps:$4 sm:$0xff]   ;;  %v461_v26 = vld [vmem:[%s665_s3 + $0x60] ss:$8 sps:$4 sm:$0xff]   ;;  %v468_v27 = vld [vmem:[%s667_s5 + $0x64] ss:$8 sps:$4 sm:$0xff]  }
   0xb   :  { %139 = vmatpush1.bf16.msra.mxu1 %v437_v9 }
   0xc   :  { %140 = vmatprep.subr.bf16.mxu1 %v440_v10  ;;  %310 = vmatpush1.bf16.msra.mxu0 %v448_v14 }
   0xd   :  { %311 = vmatprep.subr.bf16.mxu0 %v450_v15 }
   0xf   :  { %141 = vmatpush1.bf16.msra.mxu1 %v443_v13 }
  0x10   :  { %142 = vmatprep.subr.bf16.mxu1 %v446_v16  ;;  %312 = vmatpush1.bf16.msra.mxu0 %v454_v17 }
  0x11   :  { %313 = vmatprep.subr.bf16.mxu0 %v456_v19 }
  0x13   :  { %143 = vmatpush1.bf16.msra.mxu1 %v449_v18 }
  0x14   :  { %144 = vmatprep.subr.bf16.mxu1 %v452_v20  ;;  %314 = vmatpush1.bf16.msra.mxu0 %v460_v22 }
  0x15   :  { %315 = vmatprep.subr.bf16.mxu0 %v462_v23 }
  0x17   :  { %145 = vmatpush1.bf16.msra.mxu1 %v455_v21 }
  0x18   :  { %12 = vsyncpa [#allocation4], 0  ;;  %146 = vmatprep.subr.bf16.mxu1 %v458_v24  ;;  %v464_v28 = vld [vmem:[%s665_s3 + $0x74] ss:$8 sps:$4 sm:$0xff]   ;;  %316 = vmatpush1.bf16.msra.mxu0 %v466_v25  ;;  %v471_v29 = vld [vmem:[%s667_s5 + $0x60] ss:$8 sps:$4 sm:$0xff]   ;;  %v184_v38 = vstv %s662_s0 }
  0x19   :  { %v467_v30 = vld [vmem:[%s665_s3 + $0x70] ss:$8 sps:$4 sm:$0xff]   ;;  %317 = vmatprep.subr.bf16.mxu0 %v468_v27  ;;  %v472_v31 = vld [vmem:[%s667_s5 + $0x74] ss:$8 sps:$4 sm:$0xff]   ;;  %v470_v32 = vld [vmem:[%s664_s2] sm:$0xff]  }
  0x1a   :  { %v474_v33 = vld [vmem:[%s667_s5 + $0x70] ss:$8 sps:$4 sm:$0xff]   ;;  %v475_v34 = vld [vmem:[%s666_s4] sm:$0xff]   ;;  %v179_v36 = vld [vmem:[%s663_s1 + $0x8] sm:$0xff] }
  0x1b   :  { %147 = vmatpush1.bf16.msra.mxu1 %v461_v26  ;;  %v178_v35 = vld [vmem:[%s663_s1] sm:$0xff]  ;;  %v182_v40 = vunpack.c.l.bf16 %v179_v36  ;;  %v183_v41 = vunpack.c.h.bf16 %v179_v36  ;;  %s501_s1 = smov [#allocation3]  }
  0x1c   :  { %148 = vmatprep.subr.bf16.mxu1 %v464_v28  ;;  %318 = vmatpush1.bf16.msra.mxu0 %v471_v29  ;;  %v180_v37 = vunpack.c.l.bf16 %v178_v35  ;;  %v181_v39 = vunpack.c.h.bf16 %v178_v35  ;;  %s361_s0 = sshll.u32 %s501_s1, 4  ;;  %s362_s0 = int_to_ptr.vmem [resolvable:$true] %s361_s0 }
  0x1d   :  { %319 = vmatprep.subr.bf16.mxu0 %v472_v31  ;;  %v187_v44 = vmul.f32 %v184_v38, %v182_v40  ;;  %v188_v46 = vmul.f32 %v184_v38, %v183_v41  ;;  %s476_s4 = scalar_lea.vmem %s362_s0, 512  ;;  %p481_p1 = scmp.lt.s32.totalorder %s362_s0, %s362_s0 }
  0x1e   :  { %v185_v42 = vmul.f32 %v184_v38, %v180_v37  ;;  %v186_v43 = vmul.f32 %v184_v38, %v181_v39  ;;  %p477_p0 = scmp.ne.s32.totalorder %s362_s0, %s476_s4  ;;  %p482_p2 = scmp.lt.s32.totalorder %s476_s4, %s476_s4 }
  0x1f   :  { %149 = vmatpush1.bf16.msra.mxu1 %v467_v30 }
  0x20   :  { %320 = vmatpush1.bf16.msra.mxu0 %v474_v33  ;;  %p483_p3 = por %p482_p2, %p481_p1 }
  0x22   :  { %167 = vmatmul.mubr.bf16.vlgmr.msra.gmra.mrb[0].mxu1 %v470_v32  ;;  %p484_p4 = pnand %p483_p3, %p477_p0 }
  0x23   :  { %338 = vmatmul.mubr.bf16.vlgmr.msra.gmra.mrb[0].mxu0 %v475_v34 }
  0xf5   :  { %v168_v45 = vpop.f32.mrb[0].mxu1 }
  0xf6   :  { %v189_v47 = vadd.f32 %v185_v42, %v168_v45  ;;  %v170_v48 = vpop.f32.mrb[1].mxu1  ;;  %v339_v53 = vpop.f32.mrb[0].mxu0 }
  0xf7   :  { %v190_v49 = vadd.f32 %v186_v43, %v170_v48  ;;  %v172_v50 = vpop.f32.mrb[2].mxu1  ;;  %v341_v56 = vpop.f32.mrb[1].mxu0 }
  0xf8   :  { %v191_v51 = vadd.f32 %v187_v44, %v172_v50  ;;  %v174_v52 = vpop.f32.mrb[3].mxu1  ;;  %v409_v55 = vadd.f32 %v339_v53, %v189_v47  ;;  %v343_v58 = vpop.f32.mrb[2].mxu0 }
  0xf9   :  { %v192_v54 = vadd.f32 %v188_v46, %v174_v52  ;;  %v413_v57 = vadd.f32 %v341_v56, %v190_v49  ;;  %v345_v60 = vpop.f32.mrb[3].mxu0 }
  0xfa   :  { %352 = vst [vmem:[#allocation3] sm:$0xff] %v409_v55  ;;  %v417_v59 = vadd.f32 %v343_v58, %v191_v51 }
  0xfb   :  { %353 = vst [vmem:[#allocation3 + $0x8] sm:$0xff] %v413_v57  ;;  %v421_v61 = vadd.f32 %v345_v60, %v192_v54 }
  0xfc   :  { %354 = vst [vmem:[#allocation3 + $0x10] sm:$0xff] %v417_v59 }
  0xfd   :  { %355 = vst [vmem:[#allocation3 + $0x18] sm:$0xff] %v421_v61 }
  0xfe   :  { %487 = shalt.err (!%p484_p4)
}
  0xff   :  { %s488_s22 = scalar_lea.hbm %s668_s6, 512 }
 0x100   :  { %p489_p5 = scmp.ne.s32.totalorder %s668_s6, %s488_s22  ;;  %p492_p6 = scmp.lt.u32.totalorder %s488_s22, %s668_s6 }
 0x102   :  { %p494_p7 = pnand %p492_p6, %p489_p5 }
 0x104   :  { %497 = shalt.err (!%p494_p7)
}
 0x105   :  { %s502_s27 = smov 256   ;;  %s503_s28 = smov 16  }
 0x106   :  { %367 = dma.vmem_to_hbm [thread:$0]  %s362_s0, 512, %s668_s6, [#allocation4], %s502_s27, %s502_s27, %s503_s28  }
 0x107   :  { %498 = dma.done.wait [#allocation4], 512  }
 0x108   :  { %499 = vsyncadd [#allocation4], 4294966784 }
 0x109   :  { %371 = vsyncpa [#allocation4], 1 }

</bundles_post_ra>
